<compile_context>
chip_gen: v6e
topology: v6e:2x2x1
jax: 0.10.0
libtpu: 0.0.40
codegen_flags: <defaults>
</compile_context>

<pallas_src>
import functools

import jax
import jax.numpy as jnp
from jax.experimental import pallas as pl
from jax.experimental.pallas import tpu as pltpu

NEG_SLOPE = 0.2


# ----------------------------------------------------------------------------
# Fused kernel: one batch tile of the whole 3-layer MLP.
# Intermediates never leave VMEM/vregs: one HBM read (x tile) + one HBM write
# (out tile) per grid step; weights/biases stay VMEM-resident (constant
# index_map -> the pipeline does not re-DMA them across batch tiles).
# ----------------------------------------------------------------------------
def _mapping_kernel(x_ref,    # (tm, z_dim)   f32 (or bf16) activations
                    w1_ref,   # (z_dim, hidden)   bf16
                    w2_ref,   # (hidden, hidden)  bf16
                    w3_ref,   # (hidden, hidden)  bf16
                    b_ref,    # (3, hidden)       f32 stacked biases
                    out_ref): # (tm, hidden)
    cdt = w1_ref.dtype  # MXU operand dtype (bf16)

    h = jnp.dot(x_ref[...].astype(cdt), w1_ref[...],
                preferred_element_type=jnp.float32)
    h = h + b_ref[0:1, :]
    h = jnp.where(h > 0, h, NEG_SLOPE * h)            # LeakyReLU(0.2)

    h = jnp.dot(h.astype(cdt), w2_ref[...],
                preferred_element_type=jnp.float32)
    h = h + b_ref[1:2, :]
    h = jnp.where(h > 0, h, NEG_SLOPE * h)            # LeakyReLU(0.2)

    h = jnp.dot(h.astype(cdt), w3_ref[...],
                preferred_element_type=jnp.float32)
    out_ref[...] = (h + b_ref[2:3, :]).astype(out_ref.dtype)


# ----------------------------------------------------------------------------
# One-time parameter preparation (hoisted out of the per-call wrapper).
# PyTorch nn.Linear stores weight as (out, in); convert to (in, out) and cast
# matmul operands to bf16 ONCE here. Biases are stacked into a single
# (3, hidden) f32 array -> one DMA descriptor / one VMEM buffer.
# ----------------------------------------------------------------------------
def prepare_params(torch_params, matmul_dtype=jnp.bfloat16):
    return {
        "w1": jnp.transpose(torch_params["w1"]).astype(matmul_dtype),
        "w2": jnp.transpose(torch_params["w2"]).astype(matmul_dtype),
        "w3": jnp.transpose(torch_params["w3"]).astype(matmul_dtype),
        "b": jnp.stack(
            [torch_params["b1"], torch_params["b2"], torch_params["b3"]],
            axis=0).astype(jnp.float32),
    }


# ----------------------------------------------------------------------------
# Wrapper: batch-tiled 1-D parallel grid, no padding, no per-call copies.
# ----------------------------------------------------------------------------
def mapping_layers(noise, prepped, *, block_rows=1024, out_dtype=None):
    """noise: (N, z_dim). prepped: output of prepare_params. Returns (N, hidden).

    Matches MappingLayers.forward(): the module's final layer is
    Linear(hidden_dim, hidden_dim), so the output width is hidden_dim (w_dim
    is unused by the forward pass, mirrored faithfully here).
    """
    n, z_dim = noise.shape
    hidden = prepped["w1"].shape[1]
    if out_dtype is None:
        out_dtype = noise.dtype

    def _rup8(v):
        return -(-v // 8) * 8

    # Largest sublane-aligned batch tile <= block_rows, capped so the grid has
    # >= 2 programs when possible (keeps both v7x TensorCores busy).
    tm = max(8, min(block_rows, _rup8(n)))
    if n > 8:
        tm = min(tm, _rup8(-(-n // 2)))
    grid = (pl.cdiv(n, tm),)

    # NOTE: weights use constant index_maps so they are fetched once and stay
    # VMEM-resident; at hidden >= 512 on v7x (64 MiB VMEM) also consider
    # pipeline_mode=pl.Buffered(1) on the weight specs to single-buffer them.
    return pl.pallas_call(
        _mapping_kernel,
        out_shape=jax.ShapeDtypeStruct((n, hidden), out_dtype),
        grid=grid,
        in_specs=[
            pl.BlockSpec((tm, z_dim), lambda i: (i, 0)),       # activations
            pl.BlockSpec((z_dim, hidden), lambda i: (0, 0)),   # W1 (resident)
            pl.BlockSpec((hidden, hidden), lambda i: (0, 0)),  # W2 (resident)
            pl.BlockSpec((hidden, hidden), lambda i: (0, 0)),  # W3 (resident)
            pl.BlockSpec((3, hidden), lambda i: (0, 0)),       # stacked biases
        ],
        out_specs=pl.BlockSpec((tm, hidden), lambda i: (i, 0)),
        compiler_params=pltpu.CompilerParams(
            dimension_semantics=("parallel",),
            vmem_limit_bytes=32 * 1024 * 1024),
    )(noise, prepped["w1"], prepped["w2"], prepped["w3"], prepped["b"])


# ----------------------------------------------------------------------------
# Parameter init (shapes match torch nn.Linear: weight (out, in), bias (out,))
# ----------------------------------------------------------------------------
def init_params(key, z_dim, hidden_dim):
    ks = jax.random.split(key, 6)
    s = 0.1
    return {
        "w1": s * jax.random.normal(ks[0], (hidden_dim, z_dim), jnp.float32),
        "b1": s * jax.random.normal(ks[1], (hidden_dim,), jnp.float32),
        "w2": s * jax.random.normal(ks[2], (hidden_dim, hidden_dim), jnp.float32),
        "b2": s * jax.random.normal(ks[3], (hidden_dim,), jnp.float32),
        "w3": s * jax.random.normal(ks[4], (hidden_dim, hidden_dim), jnp.float32),
        "b3": s * jax.random.normal(ks[5], (hidden_dim,), jnp.float32),
    }


def _mapping_ref(noise, params):
    """Pure-JAX f32 reference of MappingLayers.forward (PyTorch layout)."""
    hi = jax.lax.Precision.HIGHEST
    h = jnp.dot(noise, params["w1"].T, precision=hi) + params["b1"]
    h = jnp.where(h > 0, h, NEG_SLOPE * h)
    h = jnp.dot(h, params["w2"].T, precision=hi) + params["b2"]
    h = jnp.where(h > 0, h, NEG_SLOPE * h)
    return jnp.dot(h, params["w3"].T, precision=hi) + params["b3"]


if __name__ == "__main__":
    key = jax.random.PRNGKey(0)
    k_param, k_noise = jax.random.split(key, 2)

    # Small shapes consistent with the module; hidden_dim lane-dense
    # (multiple of 128) so the output store is full-width vst.
    batch, z_dim, hidden_dim = 16, 64, 128

    params = init_params(k_param, z_dim, hidden_dim)
    noise = jax.random.normal(k_noise, (batch, z_dim), jnp.float32)

    # One-time prep (transposes / bias stack / bf16 cast) outside the hot path.
    prepped = prepare_params(params)

    fn = jax.jit(functools.partial(mapping_layers, block_rows=1024))
    out = fn(noise, prepped)
    jax.block_until_ready(out)

    assert out.shape == (batch, hidden_dim), out.shape
    assert bool(jnp.all(jnp.isfinite(out)))

    # Tolerance loosened vs. the pure-f32 reference because matmul operands
    # are bf16 (the review's recommended trade); accumulation is f32.
    ref = _mapping_ref(noise, params)
    max_err = float(jnp.max(jnp.abs(out - ref)))
    assert bool(jnp.allclose(out, ref, rtol=5e-2, atol=5e-2)), max_err

    print("KERNEL_OK")
</pallas_src>

<mosaic_0001>
module attributes {stable_mosaic.version = 11 : i64} {
  func.func @_mapping_kernel(%arg0: i32, %arg1: memref<8x64xf32, #tpu.memory_space<vmem>>, %arg2: memref<64x128xbf16, #tpu.memory_space<vmem>>, %arg3: memref<128x128xbf16, #tpu.memory_space<vmem>>, %arg4: memref<128x128xbf16, #tpu.memory_space<vmem>>, %arg5: memref<3x128xf32, #tpu.memory_space<vmem>>, %arg6: memref<8x128xf32, #tpu.memory_space<vmem>>) attributes {dimension_semantics = [#tpu.dimension_semantics<parallel>], iteration_bounds = array<i64: 2>, scalar_prefetch = 0 : i64, scratch_operands = 0 : i64, tpu.core_type = #tpu.core_type<tc>, window_params = [{transform_indices = @transform_0, window_bounds = array<i64: 8, 64>}, {pipeline_mode = #tpu.pipeline_mode<synchronous>, transform_indices = @transform_1, window_bounds = array<i64: 64, 128>}, {pipeline_mode = #tpu.pipeline_mode<synchronous>, transform_indices = @transform_2, window_bounds = array<i64: 128, 128>}, {pipeline_mode = #tpu.pipeline_mode<synchronous>, transform_indices = @transform_3, window_bounds = array<i64: 128, 128>}, {pipeline_mode = #tpu.pipeline_mode<synchronous>, transform_indices = @transform_4, window_bounds = array<i64: 3, 128>}, {transform_indices = @transform_5, window_bounds = array<i64: 8, 128>}]} {
    %c0 = arith.constant 0 : index
    %c0_0 = arith.constant 0 : index
    %0 = vector.load %arg1[%c0, %c0_0] : memref<8x64xf32, #tpu.memory_space<vmem>>, vector<8x64xf32>
    %1 = arith.truncf %0 : vector<8x64xf32> to vector<8x64xbf16>
    %c0_1 = arith.constant 0 : index
    %c0_2 = arith.constant 0 : index
    %2 = vector.load %arg2[%c0_1, %c0_2] : memref<64x128xbf16, #tpu.memory_space<vmem>>, vector<64x128xbf16>
    %cst = arith.constant dense<0.000000e+00> : vector<8x128xf32>
    %3 = tpu.matmul %1, %2, %cst {dimension_numbers = #tpu.dot_dimension_numbers<[1], [0], [0], [1], [0, 0, 1, 1], [], []>} : vector<8x64xbf16>, vector<64x128xbf16>, vector<8x128xf32> -> vector<8x128xf32>
    %c0_3 = arith.constant 0 : index
    %c0_4 = arith.constant 0 : index
    %4 = vector.load %arg5[%c0_3, %c0_4] : memref<3x128xf32, #tpu.memory_space<vmem>>, vector<1x128xf32>
    %5 = vector.broadcast %4 : vector<1x128xf32> to vector<8x128xf32>
    %6 = arith.addf %3, %5 : vector<8x128xf32>
    %cst_5 = arith.constant 0.000000e+00 : f32
    %7 = vector.broadcast %cst_5 : f32 to vector<8x128xf32>
    %8 = arith.cmpf ogt, %6, %7 : vector<8x128xf32>
    %cst_6 = arith.constant 2.000000e-01 : f32
    %9 = vector.broadcast %cst_6 : f32 to vector<8x128xf32>
    %10 = arith.mulf %9, %6 : vector<8x128xf32>
    %11 = arith.select %8, %6, %10 : vector<8x128xi1>, vector<8x128xf32>
    %12 = arith.truncf %11 : vector<8x128xf32> to vector<8x128xbf16>
    %c0_7 = arith.constant 0 : index
    %c0_8 = arith.constant 0 : index
    %13 = vector.load %arg3[%c0_7, %c0_8] : memref<128x128xbf16, #tpu.memory_space<vmem>>, vector<128x128xbf16>
    %cst_9 = arith.constant dense<0.000000e+00> : vector<8x128xf32>
    %14 = tpu.matmul %12, %13, %cst_9 {dimension_numbers = #tpu.dot_dimension_numbers<[1], [0], [0], [1], [0, 0, 1, 1], [], []>} : vector<8x128xbf16>, vector<128x128xbf16>, vector<8x128xf32> -> vector<8x128xf32>
    %c1 = arith.constant 1 : index
    %c0_10 = arith.constant 0 : index
    %15 = vector.load %arg5[%c1, %c0_10] : memref<3x128xf32, #tpu.memory_space<vmem>>, vector<1x128xf32>
    %16 = vector.broadcast %15 : vector<1x128xf32> to vector<8x128xf32>
    %17 = arith.addf %14, %16 : vector<8x128xf32>
    %cst_11 = arith.constant 0.000000e+00 : f32
    %18 = vector.broadcast %cst_11 : f32 to vector<8x128xf32>
    %19 = arith.cmpf ogt, %17, %18 : vector<8x128xf32>
    %cst_12 = arith.constant 2.000000e-01 : f32
    %20 = vector.broadcast %cst_12 : f32 to vector<8x128xf32>
    %21 = arith.mulf %20, %17 : vector<8x128xf32>
    %22 = arith.select %19, %17, %21 : vector<8x128xi1>, vector<8x128xf32>
    %23 = arith.truncf %22 : vector<8x128xf32> to vector<8x128xbf16>
    %c0_13 = arith.constant 0 : index
    %c0_14 = arith.constant 0 : index
    %24 = vector.load %arg4[%c0_13, %c0_14] : memref<128x128xbf16, #tpu.memory_space<vmem>>, vector<128x128xbf16>
    %cst_15 = arith.constant dense<0.000000e+00> : vector<8x128xf32>
    %25 = tpu.matmul %23, %24, %cst_15 {dimension_numbers = #tpu.dot_dimension_numbers<[1], [0], [0], [1], [0, 0, 1, 1], [], []>} : vector<8x128xbf16>, vector<128x128xbf16>, vector<8x128xf32> -> vector<8x128xf32>
    %c2 = arith.constant 2 : index
    %c0_16 = arith.constant 0 : index
    %26 = vector.load %arg5[%c2, %c0_16] : memref<3x128xf32, #tpu.memory_space<vmem>>, vector<1x128xf32>
    %27 = vector.broadcast %26 : vector<1x128xf32> to vector<8x128xf32>
    %28 = arith.addf %25, %27 : vector<8x128xf32>
    %c0_17 = arith.constant 0 : index
    %c0_18 = arith.constant 0 : index
    %29 = vector.load %arg6[%c0_17, %c0_18] : memref<8x128xf32, #tpu.memory_space<vmem>>, vector<8x128xf32>
    tpu.vector_store %arg6[%c0_17, %c0_18], %28 {strides = array<i32>} : memref<8x128xf32, #tpu.memory_space<vmem>>, vector<8x128xf32>,
    return
  }
  func.func @transform_0(%arg0: i32) -> (i32, i32) {
    %c0_i32 = arith.constant 0 : i32
    %c0_i32_0 = arith.constant 0 : i32
    return %arg0, %c0_i32 : i32, i32
  }
  func.func @transform_1(%arg0: i32) -> (i32, i32) {
    %c0_i32 = arith.constant 0 : i32
    %c0_i32_0 = arith.constant 0 : i32
    %c0_i32_1 = arith.constant 0 : i32
    return %c0_i32, %c0_i32_0 : i32, i32
  }
  func.func @transform_2(%arg0: i32) -> (i32, i32) {
    %c0_i32 = arith.constant 0 : i32
    %c0_i32_0 = arith.constant 0 : i32
    %c0_i32_1 = arith.constant 0 : i32
    return %c0_i32, %c0_i32_0 : i32, i32
  }
  func.func @transform_3(%arg0: i32) -> (i32, i32) {
    %c0_i32 = arith.constant 0 : i32
    %c0_i32_0 = arith.constant 0 : i32
    %c0_i32_1 = arith.constant 0 : i32
    return %c0_i32, %c0_i32_0 : i32, i32
  }
  func.func @transform_4(%arg0: i32) -> (i32, i32) {
    %c0_i32 = arith.constant 0 : i32
    %c0_i32_0 = arith.constant 0 : i32
    %c0_i32_1 = arith.constant 0 : i32
    return %c0_i32, %c0_i32_0 : i32, i32
  }
  func.func @transform_5(%arg0: i32) -> (i32, i32) {
    %c0_i32 = arith.constant 0 : i32
    %c0_i32_0 = arith.constant 0 : i32
    return %arg0, %c0_i32 : i32, i32
  }
}

</mosaic_0001>

<bundles_post_ra>
// kernel: mapping_layers.1
= control target key start
LH: loop header
LB: loop body
LE: loop exit
PB: predicated region body
PF: predicated region fallthrough
CT: control target
= control target key end

     0   :  { %10 = vsyncpa [#allocation3], 0  ;;  %s1450_s0 = inlined_call_operand.hbm [shape: f32[16,64], index: 0, kind: input, shape index: {}]   ;;  %s1451_s1 = inlined_call_operand.hbm [shape: bf16[64,128], index: 1, kind: input, shape index: {}]   ;;  %s1452_s2 = inlined_call_operand.hbm [shape: bf16[128,128], index: 2, kind: input, shape index: {}]   ;;  %s1453_s3 = inlined_call_operand.hbm [shape: bf16[128,128], index: 3, kind: input, shape index: {}]   ;;  %s1454_s4 = inlined_call_operand.hbm [shape: f32[3,128], index: 4, kind: input, shape index: {}]   ;;  %s1455_s5 = inlined_call_operand.hbm [shape: f32[16,128], index: 5, kind: output, shape index: {}]  }
   0x1   :  { %12 = vsyncpa [#allocation3 + $0x1], 0 }
   0x2   :  { %13 = vsyncpa [#allocation6], 0 }
   0x3   :  { %14 = vsyncpa [#allocation9], 0 }
   0x4   :  { %15 = vsyncpa [#allocation4], 0 }
   0x5   :  { %17 = vsyncpa [#allocation4 + $0x1], 0  ;;  %s1205_s18 = smov 0   ;;  %s1207_s19 = smov 0  }
   0x6   :  { %s1209_s20 = smov 0   ;;  %s1211_s21 = smov 0  }
   0x7 LB: > { %s1165_s22 = smov [#allocation5]   ;;  %s1226_s24 = sadd.s32 4294967295, %s1163_s21   ;;  %s1163_s21 = sphi %s1211_s21, %s1479_s21   ;;  %s1159_s20 = sphi %s1209_s20, %s1478_s20   ;;  %s1155_s19 = sphi %s1207_s19, %s1477_s19   ;;  %s1151_s18 = sphi %s1205_s18, %s1476_s18  }
   0x8   : > { %s176_s23 = sshll.u32 %s1165_s22, 4  ;;  %p730_p0 = scmp.ge.s32.totalorder %s1163_s21, 1  ;;  %s177_s23 = int_to_ptr.vmem [resolvable:$true] %s176_s23 }
   0x9   : > { %p1456_p1 = scmp.eq.s32.totalorder %s1226_s24, 0  ;;  %p164_p2 = scmp.lt.s32.totalorder %s1163_s21, 3 }
   0xa   : > { %s1166_s26 = smov [#allocation8]   ;;  %s1167_s29 = smov [#allocation7]  }
   0xb   : > { %p1231_p3 = pnand %p730_p0, %p164_p2  ;;  %s202_s27 = sshll.u32 %s1166_s26, 4  ;;  %s1244_s27 = int_to_ptr.vmem [resolvable:$true] %s202_s27 }
   0xc   : > { %s189_s30 = sshll.u32 %s1167_s29, 4  ;;  %s970_s6 = scalar_lea.vmem %s177_s23, 512  ;;  %s1246_s30 = int_to_ptr.vmem [resolvable:$true] %s189_s30 }
   0xd   : > { %s1460_s25 = scalar_select %p1231_p3, 1, 0 }
   0xe   : > { %p868_p5 = pneg %p1231_p3  ;;  %p971_p8 = scmp.ne.s32.totalorder %s177_s23, %s970_s6 }
   0xf   : > { %p978_p11 = scmp.lt.s32.totalorder %s177_s23, %s177_s23  ;;  %p979_p12 = scmp.lt.s32.totalorder %s970_s6, %s970_s6 }
  0x10   : > { %p1240_p6 = pnand %p868_p5, %p1456_p1 }
  0x11   : > { %p980_p13 = por %p979_p12, %p978_p11 }
  0x12   : > { %p961_p7 = pneg %p1240_p6 }
  0x14   : > { %p973_p9 = pnand %p971_p8, %p961_p7 }
  0x16   : > { %p974_p10 = pneg %p973_p9 }
  0x18   : > { %p981_p0 = pnand %p980_p13, %p974_p10 }
  0x1a   : > { %984 = shalt.err (!%p981_p0)
}
  0x1b   : > { %s1168_s7 = smov 64   ;;  %s1169_s8 = smov 4  }
  0x1c   : > { %871 = dma.hbm_to_vmem [thread:$0]  (!%p1240_p6), %s1451_s1, 512, %s177_s23, [#allocation6], %s1168_s7, %s1168_s7, %s1169_s8  }
  0x1d   : > { %s996_s11 = scalar_lea.vmem %s1244_s27, 1024  ;;  %p1004_p9 = scmp.lt.s32.totalorder %s1244_s27, %s1244_s27 }
  0x1e   : > { %p997_p2 = scmp.ne.s32.totalorder %s1244_s27, %s996_s11  ;;  %p1005_p10 = scmp.lt.s32.totalorder %s996_s11, %s996_s11 }
  0x20   : > { %p999_p5 = pnand %p997_p2, %p961_p7  ;;  %p1006_p11 = por %p1005_p10, %p1004_p9 }
  0x22   : > { %p1000_p8 = pneg %p999_p5 }
  0x24   : > { %p1007_p12 = pnand %p1006_p11, %p1000_p8 }
  0x26   : > { %1010 = shalt.err (!%p1007_p12)
}
  0x27   : > { %877 = dma.hbm_to_vmem [thread:$0]  (!%p1240_p6), %s1453_s3, 1024, %s1244_s27, [#allocation9], %s1168_s7, %s1168_s7, %s1169_s8  }
  0x28   : > { %s1022_s14 = scalar_lea.vmem %s1246_s30, 1024  ;;  %p1030_p5 = scmp.lt.s32.totalorder %s1246_s30, %s1246_s30 }
  0x29   : > { %p1023_p13 = scmp.ne.s32.totalorder %s1246_s30, %s1022_s14  ;;  %p1031_p8 = scmp.lt.s32.totalorder %s1022_s14, %s1022_s14 }
  0x2b   : > { %p1025_p0 = pnand %p1023_p13, %p961_p7  ;;  %p1032_p9 = por %p1031_p8, %p1030_p5 }
  0x2d   : > { %p1026_p2 = pneg %p1025_p0 }
  0x2f   : > { %p1033_p10 = pnand %p1032_p9, %p1026_p2 }
  0x31   : > { %1036 = shalt.err (!%p1033_p10)
}
  0x32   : > { %874 = dma.hbm_to_vmem [thread:$0]  (!%p1240_p6), %s1452_s2, 1024, %s1246_s30, [#allocation6], %s1168_s7, %s1168_s7, %s1169_s8  }
  0x33   : > { %s1170_s17 = smov [#allocation10]  }
  0x34   : > { %s216_s22 = sshll.u32 %s1170_s17, 4  ;;  %s217_s22 = int_to_ptr.vmem [resolvable:$true] %s216_s22 }
  0x35   : > { %s1048_s23 = scalar_lea.vmem %s217_s22, 64  ;;  %p1056_p0 = scmp.lt.s32.totalorder %s217_s22, %s217_s22 }
  0x36   : > { %p1049_p11 = scmp.ne.s32.totalorder %s217_s22, %s1048_s23  ;;  %p1057_p2 = scmp.lt.s32.totalorder %s1048_s23, %s1048_s23 }
  0x38   : > { %p1051_p12 = pnand %p1049_p11, %p961_p7  ;;  %p1058_p5 = por %p1057_p2, %p1056_p0 }
  0x3a   : > { %p1052_p13 = pneg %p1051_p12 }
  0x3c   : > { %p1059_p8 = pnand %p1058_p5, %p1052_p13 }
  0x3e   : > { %1062 = shalt.err (!%p1059_p8)
}
  0x3f   : > { %880 = dma.hbm_to_vmem [thread:$0]  (!%p1240_p6), %s1454_s4, 64, %s217_s22, [#allocation9]  }
  0x40   : > { %s729_s29 = sadd.s32 4294967294, %s1163_s21   ;;  %s1294_s28 = sadd.s32 1, %s1163_s21  }
  0x41   : > { %s27_s30 = ssub.s32 %s1163_s21, %s1294_s28  ;;  %s30_s6 = sadd.s32 1, %s1159_s20 }
  0x42   : > { %p28_p7 = scmp.eq.s32.totalorder %s27_s30, 0  ;;  %p37_p9 = scmp.ne.s32.totalorder %s1159_s20, %s1155_s19 }
  0x43   : > { %p38_p10 = scmp.eq.s32.totalorder %s1163_s21, 0  ;;  %p43_p11 = scmp.ne.s32.totalorder %s1155_s19, %s1151_s18 }
  0x44   : > { %s1305_s7 = scalar_select %p28_p7, %s1159_s20, %s30_s6  }
  0x45   : > { %p1307_p12 = por %p38_p10, %p37_p9  ;;  %p1313_p6 = por %p1456_p1, %p43_p11 }
  0x46   : > { %p151_p13 = scmp.eq.s32.totalorder %s1226_s24, 1  ;;  %p157_p0 = scmp.eq.s32.totalorder %s729_s29, 1 }
  0x47   : > { %s1463_s9 = scalar_select %p1313_p6, 1, 0 }
  0x48   : > { %p893_p2 = scmp.lt.s32.totalorder %s1163_s21, 2  ;;  %s227_s10 = sand.u32 1, %s1159_s20  }
  0x49   : > { %p1320_p5 = por %p151_p13, %p37_p9  ;;  %p1324_p8 = por %p157_p0, %p43_p11 }
  0x4a   : > { %s736_s13 = sshll.u32 %s227_s10, 3  ;;  %s737_s14 = sshll.u32 %s1163_s21, 7 }
  0x4b   : > { %s1464_s11 = scalar_select %p1320_p5, 1, 0 }
  0x4c   : > { %s1465_s12 = scalar_select %p1324_p8, 1, 0 }
  0x4d   : > { %s1332_s17 = scalar_lea.hbm %s1450_s0, %s737_s14  ;;  %s231_s22 = scalar_lea.vmem [#allocation2], %s736_s13 }
  0x4e   : > { %s238_s23 = sshll.u32 %s231_s22, 4  ;;  %p1336_p7 = pnand %p893_p2, %p1307_p12  ;;  %s239_s23 = int_to_ptr.vmem [resolvable:$true] %s238_s23 }
  0x4f   : > { %s228_s27 = scalar_lea.sflag [#allocation3], %s227_s10  ;;  %s1063_s29 = scalar_lea.hbm %s1332_s17, 128 }
  0x50   : > { %p1064_p9 = scmp.ne.s32.totalorder %s1332_s17, %s1063_s29  ;;  %p1065_p10 = pneg %p1336_p7 }
  0x51   : > { %s1068_s14 = scalar_lea.hbm %s1450_s0, 256  ;;  %p1069_p0 = scmp.lt.s32.totalorder %s1332_s17, %s1450_s0 }
  0x52   : > { %p1066_p11 = pnand %p1065_p10, %p1064_p9  ;;  %p1070_p12 = scmp.lt.s32.totalorder %s1068_s14, %s1063_s29 }
  0x54   : > { %p1067_p13 = pneg %p1066_p11  ;;  %p1071_p2 = por %p1070_p12, %p1069_p0 }
  0x56   : > { %p1072_p4 = pnand %p1071_p2, %p1067_p13 }
  0x58   : > { %1075 = shalt.err (!%p1072_p4)
}
  0x59   : > { %s1076_s8 = scalar_lea.vmem %s239_s23, 128  ;;  %s1171_s10 = smov [#allocation2]  }
  0x5a   : > { %p1077_p1 = scmp.ne.s32.totalorder %s239_s23, %s1076_s8  ;;  %s1081_s16 = sshll.u32 %s1171_s10, 4  ;;  %s1082_s16 = int_to_ptr.vmem [resolvable:$false] %s1081_s16 }
  0x5b   : > { %s1083_s22 = scalar_lea.vmem %s1082_s16, 256  ;;  %p1084_p9 = scmp.lt.s32.totalorder %s239_s23, %s1082_s16 }
  0x5c   : > { %p1079_p8 = pnand %p1077_p1, %p1065_p10  ;;  %p1085_p11 = scmp.lt.s32.totalorder %s1083_s22, %s1076_s8 }
  0x5e   : > { %p1080_p5 = pneg %p1079_p8  ;;  %p1086_p6 = por %p1085_p11, %p1084_p9 }
  0x60   : > { %p1087_p3 = pnand %p1086_p6, %p1080_p5 }
  0x62   : > { %1090 = shalt.err (!%p1087_p3)
}
  0x63   : > { %884 = dma.hbm_to_vmem [thread:$0]  (!%p1336_p7), %s1332_s17, 128, %s239_s23, %s228_s27  }
  0x64   : > { %p1467_p13 = scmp.ne.s32.totalorder %s1460_s25, 0 }
  0x65   : > { %s1357_s29 = sand.u32 (!%p1467_p13), 1, %s1155_s19   ;;  %p1468_p1 = scmp.ne.s32.totalorder (!%p1467_p13), %s1463_s9, 0 }
  0x66   : > { %247 = sbr.rel (%p1467_p13) target bundleno = 741 (0x2e5), region = 40  ;;  %s739_s30 = sshll.u32 (!%p1467_p13), %s1357_s29, 3 }
  0x67   : > { %s250_s6 = scalar_lea.sflag (!%p1467_p13), [#allocation3], %s1357_s29  ;;  %s253_s14 = scalar_lea.vmem (!%p1467_p13), [#allocation2], %s739_s30 }
  0x6b   : > { %1134 = dma.done.wait (%p1468_p1), %s250_s6, 128  }
  0x6c   : > { %1136 = vsyncadd (%p1468_p1), %s250_s6, 4294967168  ;;  %p1469_p3 = scmp.eq.s32.totalorder %s1226_s24, 0 }
  0x6e   : > { %1138 = dma.done.wait (%p1469_p3), [#allocation6], 1536   ;;  %p1470_p4 = pmov %p1469_p3 }
  0x6f   : > { %p1471_p6 = pmov %p1469_p3 }
  0x70   : > { %1140 = vsyncadd (%p1470_p4), [#allocation6], 4294965760 }
  0x71   : > { %1142 = dma.done.wait (%p1471_p6), [#allocation9], 1088   ;;  %p1472_p5 = pmov %p1469_p3 }
  0x72   : > { %v1172_v0 = vmov 0.0   ;;  %vm1173_vm0 = vmmov 0   ;;  %v939_v1 = vld [vmem:[#allocation5 + $0x18] sm:$0xff]   ;;  %v940_v2 = vld [vmem:[#allocation5 + $0x10] sm:$0xff]   ;;  %v941_v4 = vld [vmem:[#allocation5 + $0x8] sm:$0xff]   ;;  %vm336_vm1 = vcmask 523264  }
  0x73   : > { %1144 = vsyncadd (%p1472_p5), [#allocation9], 4294966208  ;;  %796 = vmatprep.subr.bf16.mxu0 %v1172_v0  ;;  %804 = vmatprep.mubr.msk.bf16.mxu0 %vm1173_vm0, %v1172_v0  ;;  %v943_v3 = vld [vmem:[#allocation7 + $0x38] sm:$0xff]   ;;  %v944_v5 = vld [vmem:[#allocation7 + $0x30] sm:$0xff]   ;;  %s770_s25 = sshll.u32 %s1226_s24, 7  ;;  %s295_s9 = scalar_lea.vmem [#allocation11], %s739_s30 }
  0x74   : > { %808 = vmatprep.subr.bf16.mxu1 %v1172_v0  ;;  %824 = vmatprep.mubr.msk.bf16.mxu1 %vm1173_vm0, %v1172_v0  ;;  %v942_v6 = vld [vmem:[#allocation5] sm:$0xff]   ;;  %v297_v7 = vld [vmem:[%s253_s14] sm:$0xff]  ;;  %v945_v8 = vld [vmem:[#allocation7 + $0x28] sm:$0xff]   ;;  %s621_s17 = sshll.u32 %s295_s9, 4  ;;  %s1407_s27 = scalar_lea.hbm %s1455_s5, %s770_s25  ;;  %s1409_s17 = int_to_ptr.vmem [resolvable:$true] %s621_s17 }
  0x75   : > { %797 = vmatpush3.bf16.msra.mxu0 %v939_v1  ;;  %809 = vmatpush3.bf16.msra.mxu1 %v943_v3  ;;  %v298_v9 = vpack.c.bf16 %v297_v7, %v297_v7  ;;  %v946_v10 = vld [vmem:[#allocation7 + $0x20] sm:$0xff]   ;;  %v947_v11 = vld [vmem:[#allocation7 + $0x18] sm:$0xff]   ;;  %v948_v12 = vld [vmem:[#allocation7 + $0x10] sm:$0xff]   ;;  %s608_s13 = scalar_lea.sflag [#allocation4], %s1357_s29  ;;  %s1091_s24 = scalar_lea.vmem %s1409_s17, 128 }
  0x76   : > { %798 = vmatprep.subr.bf16.mxu0 %v1172_v0  ;;  %810 = vmatprep.subr.bf16.mxu1 %v1172_v0  ;;  %v949_v13 = vld [vmem:[#allocation7 + $0x8] sm:$0xff]   ;;  %v950_v14 = vld [vmem:[#allocation7] sm:$0xff]   ;;  %v951_v15 = vld [vmem:[#allocation8 + $0x38] sm:$0xff]   ;;  %p1092_p8 = scmp.ne.s32.totalorder %s1409_s17, %s1091_s24  ;;  %p1473_p7 = scmp.ne.s32.totalorder %s1464_s11, 0 }
  0x77   : > { %v952_v16 = vld [vmem:[#allocation8 + $0x30] sm:$0xff]   ;;  %v953_v17 = vld [vmem:[#allocation8 + $0x28] sm:$0xff]   ;;  %v954_v18 = vld [vmem:[#allocation8 + $0x20] sm:$0xff]   ;;  %s1174_s15 = smov [#allocation11]  }
  0x78   : > { %v955_v19 = vld [vmem:[#allocation8 + $0x18] sm:$0xff]   ;;  %v956_v20 = vld [vmem:[#allocation8 + $0x10] sm:$0xff]   ;;  %v745_v21 = vld [vmem:[#allocation10] ss:$0 sm:$0xff]  ;;  %p1093_p10 = pnand %p1092_p8, %p1473_p7  ;;  %s1095_s8 = sshll.u32 %s1174_s15, 4  ;;  %s1096_s8 = int_to_ptr.vmem [resolvable:$false] %s1095_s8 }
  0x79   : > { %799 = vmatpush3.bf16.msra.mxu0 %v940_v2  ;;  %811 = vmatpush3.bf16.msra.mxu1 %v944_v5  ;;  %v957_v30 = vld [vmem:[#allocation8 + $0x8] sm:$0xff]   ;;  %v958_v31 = vld [vmem:[#allocation8] sm:$0xff]   ;;  %s1097_s10 = scalar_lea.vmem %s1096_s8, 256  ;;  %p1098_p12 = scmp.lt.s32.totalorder %s1409_s17, %s1096_s8 }
  0x7a   : > { %800 = vmatprep.subr.bf16.mxu0 %v1172_v0  ;;  %812 = vmatprep.subr.bf16.mxu1 %v1172_v0  ;;  %v751_v32 = vld [vmem:[#allocation10 + $0x1] ss:$0 sm:$0xff]  ;;  %v760_v41 = vld [vmem:[#allocation10 + $0x2] ss:$0 sm:$0xff]  ;;  %p1094_p0 = pneg %p1093_p10  ;;  %p1099_p2 = scmp.lt.s32.totalorder %s1097_s10, %s1091_s24 }
  0x7c   : > { %p1100_p9 = por %p1099_p2, %p1098_p12 }
  0x7d   : > { %801 = vmatpush3.bf16.msra.mxu0 %v941_v4  ;;  %813 = vmatpush3.bf16.msra.mxu1 %v945_v8 }
  0x7e   : > { %802 = vmatprep.subr.bf16.mxu0 %v1172_v0  ;;  %814 = vmatprep.subr.bf16.mxu1 %v1172_v0  ;;  %p1101_p11 = pnand %p1100_p9, %p1094_p0 }
  0x81   : > { %803 = vmatpush3.bf16.msra.mxu0 %v942_v6  ;;  %815 = vmatpush3.bf16.msra.mxu1 %v946_v10 }
  0x82   : > { %828 = vmatprep.subr.bf16.mxu0 %v1172_v0  ;;  %816 = vmatprep.subr.bf16.mxu1 %v1172_v0 }
  0x84   : > { %805 = vmatmul.mubr.msk.bf16.vlgmr.msra.gmra.mxu0 %vm336_vm1, %v298_v9 }
  0x85   : > { %844 = vmatprep.mubr.msk.bf16.mxu0 %vm1173_vm0, %v1172_v0  ;;  %817 = vmatpush3.bf16.msra.mxu1 %v947_v11 }
  0x86   : > { %818 = vmatprep.subr.bf16.mxu1 %v1172_v0  ;;  %829 = vmatpush3.bf16.msra.mxu0 %v951_v15 }
  0x87   : > { %830 = vmatprep.subr.bf16.mxu0 %v1172_v0 }
  0x89   : > { %819 = vmatpush3.bf16.msra.mxu1 %v948_v12 }
  0x8a   : > { %820 = vmatprep.subr.bf16.mxu1 %v1172_v0  ;;  %831 = vmatpush3.bf16.msra.mxu0 %v952_v16 }
  0x8b   : > { %832 = vmatprep.subr.bf16.mxu0 %v1172_v0 }
  0x8d   : > { %821 = vmatpush3.bf16.msra.mxu1 %v949_v13 }
  0x8e   : > { %822 = vmatprep.subr.bf16.mxu1 %v1172_v0  ;;  %833 = vmatpush3.bf16.msra.mxu0 %v953_v17 }
  0x8f   : > { %834 = vmatprep.subr.bf16.mxu0 %v1172_v0 }
  0x91   : > { %823 = vmatpush3.bf16.msra.mxu1 %v950_v14 }
  0x92   : > { %835 = vmatpush3.bf16.msra.mxu0 %v954_v18 }
  0x93   : > { %836 = vmatprep.subr.bf16.mxu0 %v1172_v0 }
  0x96   : > { %837 = vmatpush3.bf16.msra.mxu0 %v955_v19 }
  0x97   : > { %838 = vmatprep.subr.bf16.mxu0 %v1172_v0 }
  0x9a   : > { %839 = vmatpush3.bf16.msra.mxu0 %v956_v20 }
  0x9b   : > { %840 = vmatprep.subr.bf16.mxu0 %v1172_v0 }
  0x9e   : > { %841 = vmatpush3.bf16.msra.mxu0 %v957_v30 }
  0x9f   : > { %842 = vmatprep.subr.bf16.mxu0 %v1172_v0 }
  0xa2   : > { %843 = vmatpush3.bf16.msra.mxu0 %v958_v31 }
 0x144   : > { %v374_v22 = vpop.f32.mrf.mxu0 }
 0x145   : > { %v375_v23 = vadd.f32 %v745_v21, %v374_v22 }
 0x146   : > { %v806_v24 = vpop.f32.mrf.mxu0 }
 0x147   : > { %vm380_vm2 = vcmp.gt.f32.partialorder %v375_v23, 0.0  ;;  %v381_v25 = vmul.f32 0.2, %v375_v23 }
 0x148   : > { %v377_v26 = vpop.f32.mrf.mxu0 }
 0x149   : > { %v382_v27 = vsel %vm380_vm2, %v375_v23, %v381_v25 }
 0x14a   : > { %v807_v28 = vpop.f32.mrf.mxu0  ;;  %v383_v29 = vpack.c.bf16 %v382_v27, %v382_v27 }
 0x14c   : > { %825 = vmatmul.mubr.bf16.vlgmr.msra.gmra.mxu1 %v383_v29 }
 0x20c   : > { %v487_v33 = vpop.f32.mrf.mxu1 }
 0x20d   : > { %v488_v34 = vadd.f32 %v751_v32, %v487_v33 }
 0x20e   : > { %v826_v35 = vpop.f32.mrf.mxu1 }
 0x20f   : > { %vm493_vm3 = vcmp.gt.f32.partialorder %v488_v34, 0.0  ;;  %v494_v36 = vmul.f32 0.2, %v488_v34 }
 0x210   : > { %v490_v37 = vpop.f32.mrf.mxu1 }
 0x211   : > { %v495_v38 = vsel %vm493_vm3, %v488_v34, %v494_v36 }
 0x212   : > { %v496_v39 = vpack.c.bf16 %v495_v38, %v495_v38  ;;  %v827_v40 = vpop.f32.mrf.mxu1 }
 0x214   : > { %845 = vmatmul.mubr.bf16.vlgmr.msra.gmra.mxu0 %v496_v39 }
 0x2d4   : > { %v600_v42 = vpop.f32.mrf.mxu0 }
 0x2d5   : > { %v601_v43 = vadd.f32 %v760_v41, %v600_v42 }
 0x2d6   : > { %v846_v44 = vpop.f32.mrf.mxu0 }
 0x2d7   : > { %606 = vst [vmem:[%s295_s9] sm:$0xff] %v601_v43 }
 0x2d8   : > { %v603_v45 = vpop.f32.mrf.mxu0 }
 0x2d9   : > { %1104 = shalt.err (!%p1101_p11)
}
 0x2da   : > { %s1105_s16 = scalar_lea.hbm %s1407_s27, 128  ;;  %s1109_s30 = scalar_lea.hbm %s1455_s5, 256 }
 0x2db   : > { %p1106_p13 = scmp.ne.s32.totalorder %s1407_s27, %s1105_s16  ;;  %p1110_p4 = scmp.lt.s32.totalorder %s1407_s27, %s1455_s5 }
 0x2dc   : > { %p1111_p6 = scmp.lt.s32.totalorder %s1109_s30, %s1105_s16 }
 0x2dd   : > { %p1107_p1 = pnand %p1106_p13, %p1473_p7 }
 0x2de   : > { %p1112_p5 = por %p1111_p6, %p1110_p4 }
 0x2df   : > { %p1108_p3 = pneg %p1107_p1 }
 0x2e1   : > { %p1113_p8 = pnand %p1112_p5, %p1108_p3 }
 0x2e3   : > { %1116 = shalt.err (!%p1113_p8)
}
 0x2e4   : > { %866 = dma.vmem_to_hbm [thread:$0]  (%p1473_p7), %s1409_s17, 128, %s1407_s27, %s608_s13   ;;  %v847_v46 = vpop.f32.mrf.mxu0 }
 0x2e5 PF: > { %s633_s25 = sand.u32 1, %s1151_s18   ;;  %p1474_p10 = scmp.ne.s32.totalorder %s1465_s12, 0 }
 0x2e6   : > { %p1475_p0 = scmp.ge.s32.totalorder %s1163_s21, 2  ;;  %s634_s9 = scalar_lea.sflag [#allocation4], %s633_s25 }
 0x2e8   : > { %p886_p12 = pnand %p1475_p0, %p1474_p10 }
 0x2ea   : > { %p887_p2 = pneg %p886_p12 }
 0x2ec   : > { %1146 = dma.done.wait (%p887_p2), %s634_s9, 128  }
 0x2ed   : > { %1148 = vsyncadd (%p887_p2), %s634_s9, 4294967168  ;;  %p20_p9 = scmp.ge.s32.totalorder %s1294_s28, 4   ;;  %s1476_s18 = smov %s1155_s19 }
 0x2ee   : > { %s1477_s19 = smov %s1159_s20  ;;  %s1478_s20 = smov %s1305_s7 }
 0x2ef   : > { %s1479_s21 = smov %s1294_s28  ;;  %22 = sbr.rel (!%p20_p9) target bundleno = 7 (0x7), region = 101 }
 0x2f4   :  { %639 = vsyncpa [#allocation3], 1 }
 0x2f5   :  { %641 = vsyncpa [#allocation3 + $0x1], 1 }
 0x2f6   :  { %642 = vsyncpa [#allocation6], 1 }
 0x2f7   :  { %643 = vsyncpa [#allocation9], 1 }
 0x2f8   :  { %644 = vsyncpa [#allocation4], 1 }
 0x2f9   :  { %646 = vsyncpa [#allocation4 + $0x1], 1 }

</bundles_post_ra>
